<compile_context>
chip_gen: v6e
topology: v6e:2x2x1
jax: 0.10.0
libtpu: 0.0.40
codegen_flags: <defaults>
</compile_context>

<pallas_src>
import functools
import math

import jax
import jax.numpy as jnp
from jax.experimental import pallas as pl
from jax.experimental.pallas import tpu as pltpu


def _sigmoid_range_kernel(x_ref, o_ref, *, low, high):
    """Elementwise sigmoid-range on one (tb, width) lane-dense tile."""
    x = x_ref[...].astype(jnp.float32)          # upcast in-register (VMEM stays native)
    # sigmoid(x) = 1 / (1 + exp(-x)); exp lowers to the EUP (separate VLIW slot).
    s = 1.0 / (1.0 + jnp.exp(-x))
    o_ref[...] = (s * (high - low) + low).astype(o_ref.dtype)


def sigmoid_range_pallas(x, low, high, *, min_pallas_elements=65536):
    """out = sigmoid(x) * (high - low) + low, any input shape / float dtype."""
    orig_shape = x.shape
    dtype = x.dtype
    n = math.prod(orig_shape) if orig_shape else 1

    # TODO(synk): if low/high can be traced JAX values, pass them via SMEM
    # scalar prefetch instead of baking compile-time constants.
    low = float(low)
    high = float(high)

    # Small prediction-head tensors: let XLA fuse the elementwise op instead of
    # paying pallas_call fixed cost (custom call + pipeline prologue).
    if n < min_pallas_elements:
        return (jax.nn.sigmoid(x) * (high - low) + low).astype(dtype)

    LANE = 128
    itemsize = jnp.dtype(dtype).itemsize
    sub = {4: 8, 2: 16, 1: 32}.get(itemsize, 8)      # sublane multiple per dtype

    # ---- choose a lane-dense 2D view -------------------------------------
    # Fast path: some 128-multiple width divides n exactly -> free reshape,
    # no pad and no post-kernel slice.
    width = 0
    for w in (1024, 896, 768, 640, 512, 384, 256, 128):
        if n % w == 0:
            width = w
            break

    needs_unpad = False
    if width:
        rows = n // width
        x2d = x.reshape(rows, width)
    else:
        # Ragged size: pick a width and pad the flat tail (only case that pays
        # an extra HBM pass).
        width = LANE
        while width * 2 <= 1024 and n >= (width * 2) * sub:
            width *= 2
        rows = -(-n // width)
        rows = -(-rows // sub) * sub                  # round rows to sublane multiple
        padded_n = rows * width
        flat = x.reshape(-1)
        if padded_n != n:
            flat = jnp.pad(flat, (0, padded_n - n))
            needs_unpad = True
        x2d = flat.reshape(rows, width)

    # ---- tiling ------------------------------------------------------------
    row_bytes = width * itemsize
    MAX_BLOCK_BYTES = 4 * 1024 * 1024                 # 4 MiB block (16 MiB double-buffered)
    tb = max(sub, (min(1024, MAX_BLOCK_BYTES // row_bytes) // sub) * sub)

    rows_ceil = -(-rows // sub) * sub
    if rows_ceil <= tb:
        # Whole tensor fits in one block. Split into two only if each half
        # stays large (>= 512 KiB) so the split helps v7x megacore without
        # hurting the single-TC chips (v5e/v6e) via per-step overhead.
        half = ((rows_ceil // 2) // sub) * sub
        if half > 0 and half * row_bytes >= 512 * 1024:
            tb = half
        else:
            tb = rows_ceil
    grid = (pl.cdiv(rows, tb),)

    kernel = functools.partial(_sigmoid_range_kernel, low=low, high=high)

    out2d = pl.pallas_call(
        kernel,
        out_shape=jax.ShapeDtypeStruct(x2d.shape, dtype),
        grid_spec=pltpu.PrefetchScalarGridSpec(
            num_scalar_prefetch=0,
            grid=grid,
            in_specs=[pl.BlockSpec((tb, width), lambda i: (i, 0))],
            out_specs=pl.BlockSpec((tb, width), lambda i: (i, 0)),
        ),
        compiler_params=pltpu.CompilerParams(
            dimension_semantics=("parallel",),
            vmem_limit_bytes=32 * 1024 * 1024,
        ),
        cost_estimate=pl.CostEstimate(
            flops=5 * rows * width,                    # neg, add, recip, mul, add
            transcendentals=rows * width,              # one exp per element
            bytes_accessed=2 * rows * width * itemsize,
        ),
    )(x2d)

    out = out2d
    if needs_unpad:
        out = out.reshape(-1)[:n]
    return out.reshape(orig_shape)


def reference_forward(x, low, high):
    """Pure-JAX reference mirroring torch.sigmoid(x) * (high - low) + low."""
    return jax.nn.sigmoid(x) * (high - low) + low


if __name__ == "__main__":
    low, high = 0.5, 5.5
    key = jax.random.PRNGKey(0)
    k1, k2, k3 = jax.random.split(key, 3)

    # 1) Typical small prediction-head output -> default path (fused XLA fallback).
    x_small = 3.0 * jax.random.normal(k1, (64, 32), jnp.float32)
    out_small = jax.block_until_ready(sigmoid_range_pallas(x_small, low, high))
    ref_small = reference_forward(x_small, low, high)
    assert out_small.shape == x_small.shape
    assert jnp.allclose(out_small, ref_small, atol=1e-5, rtol=1e-5)

    # 2) Force the Pallas kernel on a lane-aligned f32 tensor (fast path, no pad).
    x_f32 = 3.0 * jax.random.normal(k2, (16, 8, 128), jnp.float32)
    out_f32 = jax.block_until_ready(
        sigmoid_range_pallas(x_f32, low, high, min_pallas_elements=0))
    ref_f32 = reference_forward(x_f32, low, high)
    assert out_f32.shape == x_f32.shape and out_f32.dtype == x_f32.dtype
    assert jnp.allclose(out_f32, ref_f32, atol=1e-5, rtol=1e-5)
    assert bool(jnp.all(out_f32 >= low)) and bool(jnp.all(out_f32 <= high))

    # 3) Force the Pallas kernel on a ragged bf16 tensor (pad path, native dtype).
    x_bf16 = (3.0 * jax.random.normal(k3, (37, 50), jnp.float32)).astype(jnp.bfloat16)
    out_bf16 = jax.block_until_ready(
        sigmoid_range_pallas(x_bf16, low, high, min_pallas_elements=0))
    ref_bf16 = reference_forward(x_bf16.astype(jnp.float32), low, high)
    assert out_bf16.shape == x_bf16.shape and out_bf16.dtype == jnp.bfloat16
    assert jnp.allclose(out_bf16.astype(jnp.float32), ref_bf16, atol=2e-2, rtol=2e-2)

    print("KERNEL_OK")
</pallas_src>

<mosaic_0001>
module attributes {stable_mosaic.version = 11 : i64} {
  func.func @_sigmoid_range_kernel(%arg0: i32, %arg1: memref<16x1024xf32, #tpu.memory_space<vmem>>, %arg2: memref<16x1024xf32, #tpu.memory_space<vmem>>) attributes {dimension_semantics = [#tpu.dimension_semantics<parallel>], iteration_bounds = array<i64: 1>, scalar_prefetch = 0 : i64, scratch_operands = 0 : i64, tpu.core_type = #tpu.core_type<tc>, window_params = [{transform_indices = @transform_0, window_bounds = array<i64: 16, 1024>}, {transform_indices = @transform_1, window_bounds = array<i64: 16, 1024>}]} {
    %c0 = arith.constant 0 : index
    %c0_0 = arith.constant 0 : index
    %0 = vector.load %arg1[%c0, %c0_0] : memref<16x1024xf32, #tpu.memory_space<vmem>>, vector<16x1024xf32>
    %cst = arith.constant 0.000000e+00 : f32
    %1 = vector.broadcast %cst : f32 to vector<16x1024xf32>
    %2 = arith.subf %1, %0 : vector<16x1024xf32>
    %3 = math.exp %2 : vector<16x1024xf32>
    %cst_1 = arith.constant 1.000000e+00 : f32
    %4 = vector.broadcast %cst_1 : f32 to vector<16x1024xf32>
    %5 = arith.addf %4, %3 : vector<16x1024xf32>
    %cst_2 = arith.constant 1.000000e+00 : f32
    %6 = vector.broadcast %cst_2 : f32 to vector<16x1024xf32>
    %7 = arith.divf %6, %5 : vector<16x1024xf32>
    %cst_3 = arith.constant 5.000000e+00 : f32
    %8 = vector.broadcast %cst_3 : f32 to vector<16x1024xf32>
    %9 = arith.mulf %7, %8 : vector<16x1024xf32>
    %cst_4 = arith.constant 5.000000e-01 : f32
    %10 = vector.broadcast %cst_4 : f32 to vector<16x1024xf32>
    %11 = arith.addf %9, %10 : vector<16x1024xf32>
    %c0_5 = arith.constant 0 : index
    %c0_6 = arith.constant 0 : index
    %12 = vector.load %arg2[%c0_5, %c0_6] : memref<16x1024xf32, #tpu.memory_space<vmem>>, vector<16x1024xf32>
    tpu.vector_store %arg2[%c0_5, %c0_6], %11 {strides = array<i32>} : memref<16x1024xf32, #tpu.memory_space<vmem>>, vector<16x1024xf32>,
    return
  }
  func.func @transform_0(%arg0: i32) -> (i32, i32) {
    %c0_i32 = arith.constant 0 : i32
    %c0_i32_0 = arith.constant 0 : i32
    return %arg0, %c0_i32 : i32, i32
  }
  func.func @transform_1(%arg0: i32) -> (i32, i32) {
    %c0_i32 = arith.constant 0 : i32
    %c0_i32_0 = arith.constant 0 : i32
    return %arg0, %c0_i32 : i32, i32
  }
}

</mosaic_0001>

<bundles_post_ra>
// kernel: tpu_custom_call.1
= control target key start
LH: loop header
LB: loop body
LE: loop exit
PB: predicated region body
PF: predicated region fallthrough
CT: control target
= control target key end

     0   :  { %6 = vsyncpa [#allocation3], 0  ;;  %s338_s0 = inlined_call_operand.hbm [shape: f32[16,1024], index: 0, kind: input, shape index: {}]   ;;  %s339_s1 = inlined_call_operand.hbm [shape: f32[16,1024], index: 1, kind: output, shape index: {}]  }
   0x1   :  { %7 = vsyncpa [#allocation4], 0  ;;  %s312_s6 = smov [#allocation2]  }
   0x2   :  { %s13_s7 = sshll.u32 %s312_s6, 4  ;;  %s14_s7 = int_to_ptr.vmem [resolvable:$true] %s13_s7 }
   0x3   :  { %s276_s8 = scalar_lea.vmem %s14_s7, 2048  ;;  %p281_p1 = scmp.lt.s32.totalorder %s14_s7, %s14_s7 }
   0x4   :  { %p277_p0 = scmp.ne.s32.totalorder %s14_s7, %s276_s8  ;;  %p282_p2 = scmp.lt.s32.totalorder %s276_s8, %s276_s8 }
   0x6   :  { %p283_p3 = por %p282_p2, %p281_p1 }
   0x8   :  { %p284_p4 = pnand %p283_p3, %p277_p0 }
   0xa   :  { %287 = shalt.err (!%p284_p4)
}
   0xb   :  { %s313_s9 = smov 1024   ;;  %s314_s10 = smov 64  }
   0xc   :  { %19 = dma.hbm_to_vmem [thread:$0]  %s338_s0, 2048, %s14_s7, [#allocation3], %s313_s9, %s313_s9, %s314_s10  }
   0xd   :  { %308 = dma.done.wait [#allocation3], 2048  }
   0xe   :  { %309 = vsyncadd [#allocation3], 4294965248  ;;  %v23_v0 = vld [vmem:[#allocation2] sm:$0xff]  ;;  %v24_v1 = vld [vmem:[#allocation2 + $0x8] sm:$0xff]  ;;  %s315_s0 = smov [#allocation5]  }
   0xf   :  { %v25_v2 = vld [vmem:[#allocation2 + $0x10] sm:$0xff]  ;;  %v39_v3 = vsub.f32 0.0, %v23_v0  ;;  %v40_v4 = vsub.f32 0.0, %v24_v1  ;;  %v26_v6 = vld [vmem:[#allocation2 + $0x18] sm:$0xff]  ;;  %v27_v7 = vld [vmem:[#allocation2 + $0x20] sm:$0xff]  ;;  %s188_s13 = sshll.u32 %s315_s0, 4  ;;  %s189_s13 = int_to_ptr.vmem [resolvable:$true] %s188_s13 }
  0x10   :  { %v41_v5 = vsub.f32 0.0, %v25_v2  ;;  %v28_v8 = vld [vmem:[#allocation2 + $0x28] sm:$0xff]  ;;  %v42_v9 = vsub.f32 0.0, %v26_v6  ;;  %v43_v10 = vsub.f32 0.0, %v27_v7  ;;  %v29_v12 = vld [vmem:[#allocation2 + $0x30] sm:$0xff]  ;;  %v30_v13 = vld [vmem:[#allocation2 + $0x38] sm:$0xff]  ;;  %p293_p6 = scmp.lt.s32.totalorder %s189_s13, %s189_s13 }
  0x11   :  { %v44_v11 = vsub.f32 0.0, %v28_v8  ;;  %v31_v14 = vld [vmem:[#allocation2 + $0x40] sm:$0xff]  ;;  %v55_v15 = vmul.f32 1.442695, %v39_v3  ;;  %v57_v16 = vmul.f32 1.442695, %v40_v4 }
  0x12   :  { %v59_v17 = vmul.f32 1.442695, %v41_v5  ;;  %v61_v18 = vmul.f32 1.442695, %v42_v9  ;;  %v63_v19 = vmul.f32 1.442695, %v43_v10 }
  0x13   :  { %204 = vpow2.f32 %v55_v15  ;;  %v45_v20 = vsub.f32 0.0, %v29_v12  ;;  %v46_v21 = vsub.f32 0.0, %v30_v13  ;;  %v47_v22 = vsub.f32 0.0, %v31_v14  ;;  %v32_v23 = vld [vmem:[#allocation2 + $0x48] sm:$0xff]  ;;  %v33_v24 = vld [vmem:[#allocation2 + $0x50] sm:$0xff]  ;;  %v34_v25 = vld [vmem:[#allocation2 + $0x58] sm:$0xff] }
  0x14   :  { %206 = vpow2.f32 %v57_v16  ;;  %v65_v26 = vmul.f32 1.442695, %v44_v11  ;;  %v48_v27 = vsub.f32 0.0, %v32_v23  ;;  %v35_v28 = vld [vmem:[#allocation2 + $0x60] sm:$0xff]  ;;  %v49_v30 = vsub.f32 0.0, %v33_v24  ;;  %v36_v31 = vld [vmem:[#allocation2 + $0x68] sm:$0xff] }
  0x15   :  { %208 = vpow2.f32 %v59_v17  ;;  %v67_v29 = vmul.f32 1.442695, %v45_v20  ;;  %v69_v32 = vmul.f32 1.442695, %v46_v21  ;;  %v50_v33 = vsub.f32 0.0, %v34_v25  ;;  %v37_v34 = vld [vmem:[#allocation2 + $0x70] sm:$0xff] }
  0x16   :  { %210 = vpow2.f32 %v61_v18  ;;  %v71_v35 = vmul.f32 1.442695, %v47_v22  ;;  %v51_v36 = vsub.f32 0.0, %v35_v28  ;;  %v38_v37 = vld [vmem:[#allocation2 + $0x78] sm:$0xff]  ;;  %v73_v38 = vmul.f32 1.442695, %v48_v27 }
  0x17   :  { %212 = vpow2.f32 %v63_v19  ;;  %v52_v39 = vsub.f32 0.0, %v36_v31  ;;  %v75_v40 = vmul.f32 1.442695, %v49_v30  ;;  %v53_v41 = vsub.f32 0.0, %v37_v34  ;;  %s288_s14 = scalar_lea.vmem %s189_s13, 2048 }
  0x18   :  { %214 = vpow2.f32 %v65_v26  ;;  %v77_v42 = vmul.f32 1.442695, %v50_v33  ;;  %v54_v43 = vsub.f32 0.0, %v38_v37  ;;  %v79_v44 = vmul.f32 1.442695, %v51_v36  ;;  %p289_p5 = scmp.ne.s32.totalorder %s189_s13, %s288_s14  ;;  %p294_p7 = scmp.lt.s32.totalorder %s288_s14, %s288_s14 }
  0x19   :  { %216 = vpow2.f32 %v67_v29  ;;  %v81_v45 = vmul.f32 1.442695, %v52_v39  ;;  %v83_v46 = vmul.f32 1.442695, %v53_v41 }
  0x1a   :  { %218 = vpow2.f32 %v69_v32  ;;  %v85_v47 = vmul.f32 1.442695, %v54_v43  ;;  %p295_p8 = por %p294_p7, %p293_p6 }
  0x1b   :  { %220 = vpow2.f32 %v71_v35 }
  0x1c   :  { %222 = vpow2.f32 %v73_v38  ;;  %p296_p9 = pnand %p295_p8, %p289_p5 }
  0x1d   :  { %224 = vpow2.f32 %v75_v40 }
  0x1e   :  { %226 = vpow2.f32 %v77_v42 }
  0x1f   :  { %228 = vpow2.f32 %v79_v44 }
  0x20   :  { %v205_v48 = vpop.eup %204  ;;  %230 = vpow2.f32 %v81_v45 }
  0x21   :  { %v207_v49 = vpop.eup %206  ;;  %v87_v50 = vadd.f32 1.0, %v205_v48  ;;  %232 = vpow2.f32 %v83_v46 }
  0x22   :  { %v209_v51 = vpop.eup %208  ;;  %v88_v52 = vadd.f32 1.0, %v207_v49  ;;  %234 = vpow2.f32 %v85_v47 }
  0x23   :  { %v211_v53 = vpop.eup %210  ;;  %236 = vrcp.f32 %v87_v50  ;;  %v89_v54 = vadd.f32 1.0, %v209_v51 }
  0x24   :  { %v213_v55 = vpop.eup %212  ;;  %238 = vrcp.f32 %v88_v52  ;;  %v90_v56 = vadd.f32 1.0, %v211_v53 }
  0x25   :  { %v215_v57 = vpop.eup %214  ;;  %240 = vrcp.f32 %v89_v54  ;;  %v91_v58 = vadd.f32 1.0, %v213_v55 }
  0x26   :  { %v217_v59 = vpop.eup %216  ;;  %242 = vrcp.f32 %v90_v56  ;;  %v92_v60 = vadd.f32 1.0, %v215_v57 }
  0x27   :  { %v219_v61 = vpop.eup %218  ;;  %244 = vrcp.f32 %v91_v58  ;;  %v93_v62 = vadd.f32 1.0, %v217_v59 }
  0x28   :  { %v221_v63 = vpop.eup %220  ;;  %246 = vrcp.f32 %v92_v60  ;;  %v94_v0 = vadd.f32 1.0, %v219_v61 }
  0x29   :  { %v223_v1 = vpop.eup %222  ;;  %248 = vrcp.f32 %v93_v62  ;;  %v95_v2 = vadd.f32 1.0, %v221_v63 }
  0x2a   :  { %v225_v3 = vpop.eup %224  ;;  %250 = vrcp.f32 %v94_v0  ;;  %v96_v4 = vadd.f32 1.0, %v223_v1 }
  0x2b   :  { %v227_v5 = vpop.eup %226  ;;  %252 = vrcp.f32 %v95_v2  ;;  %v97_v6 = vadd.f32 1.0, %v225_v3 }
  0x2c   :  { %v229_v7 = vpop.eup %228  ;;  %254 = vrcp.f32 %v96_v4  ;;  %v98_v8 = vadd.f32 1.0, %v227_v5 }
  0x2d   :  { %v231_v9 = vpop.eup %230  ;;  %256 = vrcp.f32 %v97_v6  ;;  %v99_v10 = vadd.f32 1.0, %v229_v7 }
  0x2e   :  { %v233_v11 = vpop.eup %232  ;;  %258 = vrcp.f32 %v98_v8  ;;  %v100_v12 = vadd.f32 1.0, %v231_v9 }
  0x2f   :  { %v235_v13 = vpop.eup %234  ;;  %260 = vrcp.f32 %v99_v10  ;;  %v101_v14 = vadd.f32 1.0, %v233_v11 }
  0x30   :  { %v237_v15 = vpop.eup %236  ;;  %262 = vrcp.f32 %v100_v12  ;;  %v102_v16 = vadd.f32 1.0, %v235_v13 }
  0x31   :  { %v239_v17 = vpop.eup %238  ;;  %v135_v18 = vmul.f32 5.0, %v237_v15  ;;  %264 = vrcp.f32 %v101_v14 }
  0x32   :  { %v241_v19 = vpop.eup %240  ;;  %v136_v20 = vmul.f32 5.0, %v239_v17  ;;  %266 = vrcp.f32 %v102_v16 }
  0x33   :  { %v243_v21 = vpop.eup %242  ;;  %v151_v22 = vadd.f32 0.5, %v135_v18  ;;  %v137_v23 = vmul.f32 5.0, %v241_v19 }
  0x34   :  { %v245_v24 = vpop.eup %244  ;;  %v152_v25 = vadd.f32 0.5, %v136_v20  ;;  %v138_v26 = vmul.f32 5.0, %v243_v21 }
  0x35   :  { %v247_v27 = vpop.eup %246  ;;  %167 = vst [vmem:[#allocation5] sm:$0xff] %v151_v22  ;;  %v153_v28 = vadd.f32 0.5, %v137_v23  ;;  %v139_v29 = vmul.f32 5.0, %v245_v24 }
  0x36   :  { %v249_v30 = vpop.eup %248  ;;  %168 = vst [vmem:[#allocation5 + $0x8] sm:$0xff] %v152_v25  ;;  %v154_v31 = vadd.f32 0.5, %v138_v26  ;;  %v140_v32 = vmul.f32 5.0, %v247_v27 }
  0x37   :  { %v251_v33 = vpop.eup %250  ;;  %169 = vst [vmem:[#allocation5 + $0x10] sm:$0xff] %v153_v28  ;;  %v155_v34 = vadd.f32 0.5, %v139_v29  ;;  %v141_v35 = vmul.f32 5.0, %v249_v30 }
  0x38   :  { %v253_v36 = vpop.eup %252  ;;  %170 = vst [vmem:[#allocation5 + $0x18] sm:$0xff] %v154_v31  ;;  %v156_v37 = vadd.f32 0.5, %v140_v32  ;;  %v142_v38 = vmul.f32 5.0, %v251_v33 }
  0x39   :  { %v255_v39 = vpop.eup %254  ;;  %171 = vst [vmem:[#allocation5 + $0x20] sm:$0xff] %v155_v34  ;;  %v157_v40 = vadd.f32 0.5, %v141_v35  ;;  %v143_v41 = vmul.f32 5.0, %v253_v36 }
  0x3a   :  { %v257_v42 = vpop.eup %256  ;;  %172 = vst [vmem:[#allocation5 + $0x28] sm:$0xff] %v156_v37  ;;  %v158_v43 = vadd.f32 0.5, %v142_v38  ;;  %v144_v44 = vmul.f32 5.0, %v255_v39 }
  0x3b   :  { %v259_v45 = vpop.eup %258  ;;  %173 = vst [vmem:[#allocation5 + $0x30] sm:$0xff] %v157_v40  ;;  %v159_v46 = vadd.f32 0.5, %v143_v41  ;;  %v145_v47 = vmul.f32 5.0, %v257_v42 }
  0x3c   :  { %v261_v48 = vpop.eup %260  ;;  %174 = vst [vmem:[#allocation5 + $0x38] sm:$0xff] %v158_v43  ;;  %v160_v49 = vadd.f32 0.5, %v144_v44  ;;  %v146_v50 = vmul.f32 5.0, %v259_v45 }
  0x3d   :  { %v263_v51 = vpop.eup %262  ;;  %175 = vst [vmem:[#allocation5 + $0x40] sm:$0xff] %v159_v46  ;;  %v161_v52 = vadd.f32 0.5, %v145_v47  ;;  %v147_v53 = vmul.f32 5.0, %v261_v48 }
  0x3e   :  { %v265_v54 = vpop.eup %264  ;;  %176 = vst [vmem:[#allocation5 + $0x48] sm:$0xff] %v160_v49  ;;  %v162_v55 = vadd.f32 0.5, %v146_v50  ;;  %v148_v56 = vmul.f32 5.0, %v263_v51 }
  0x3f   :  { %v267_v57 = vpop.eup %266  ;;  %177 = vst [vmem:[#allocation5 + $0x50] sm:$0xff] %v161_v52  ;;  %v163_v58 = vadd.f32 0.5, %v147_v53  ;;  %v149_v59 = vmul.f32 5.0, %v265_v54 }
  0x40   :  { %178 = vst [vmem:[#allocation5 + $0x58] sm:$0xff] %v162_v55  ;;  %v164_v60 = vadd.f32 0.5, %v148_v56  ;;  %v150_v61 = vmul.f32 5.0, %v267_v57 }
  0x41   :  { %179 = vst [vmem:[#allocation5 + $0x60] sm:$0xff] %v163_v58  ;;  %v165_v62 = vadd.f32 0.5, %v149_v59 }
  0x42   :  { %180 = vst [vmem:[#allocation5 + $0x68] sm:$0xff] %v164_v60  ;;  %v166_v63 = vadd.f32 0.5, %v150_v61 }
  0x43   :  { %181 = vst [vmem:[#allocation5 + $0x70] sm:$0xff] %v165_v62 }
  0x44   :  { %182 = vst [vmem:[#allocation5 + $0x78] sm:$0xff] %v166_v63 }
  0x45   :  { %299 = shalt.err (!%p296_p9)
}
  0x46   :  { %194 = dma.vmem_to_hbm [thread:$0]  %s189_s13, 2048, %s339_s1, [#allocation4], %s313_s9, %s313_s9, %s314_s10  }
  0x47   :  { %310 = dma.done.wait [#allocation4], 2048  }
  0x48   :  { %311 = vsyncadd [#allocation4], 4294965248 }
  0x49   :  { %198 = vsyncpa [#allocation3], 1 }
  0x4a   :  { %199 = vsyncpa [#allocation4], 1 }

</bundles_post_ra>
